<compile_context>
chip_gen: v7x
topology: tpu7x:2x2x1
jax: 0.10.0
libtpu: 0.0.40
codegen_flags: <defaults>
</compile_context>

<pallas_src>
import functools
import math

import jax
import jax.numpy as jnp
from jax.experimental import pallas as pl
from jax.experimental.pallas import tpu as pltpu


def _round_up(x, m):
    return ((x + m - 1) // m) * m


def _cdiv(a, b):
    return (a + b - 1) // b


def _embed_kernel(ids_ref, table_ref, out_ref, *, scale, vocab, ragged_last):
    """One grid step = (T, d_model) output tile x (tv, d_model) table tile.

    ids_ref:   (T, 1)        int32 token ids for this token tile (VMEM)
    table_ref: (tv, d_model) slice of the embedding table (resident when tv==vocab)
    out_ref:   (T, d_model)  output tile, resident across the vocab grid axis
    """
    j = pl.program_id(1)
    nj = pl.num_programs(1)
    tv = table_ref.shape[0]
    t = ids_ref.shape[0]

    tile = table_ref[...]
    if ragged_last:
        # Last vocab tile may extend past the (un-padded) table: zero the OOB rows
        # so garbage * 0 cannot become NaN in the matmul.
        rows = jax.lax.broadcasted_iota(jnp.int32, (tv, 1), 0) + j * tv
        tile = jnp.where(rows < vocab, tile, 0.0)

    # One-hot selector against a j-invariant column iota (ids shifted instead of
    # the iota, saving a full (T, tv) add per step).
    local_ids = ids_ref[...] - j * tv                        # (T, 1)
    cols = jax.lax.broadcasted_iota(jnp.int32, (t, tv), 1)   # (T, tv), j-invariant
    one_hot = (local_ids == cols).astype(tile.dtype)         # exact 0 / 1
    prod = jnp.dot(one_hot, tile, preferred_element_type=jnp.float32)

    # Accumulate straight into the resident output tile (no scratch accumulator).
    @pl.when(j == 0)
    def _():
        out_ref[...] = prod.astype(out_ref.dtype)

    @pl.when(j > 0)
    def _():
        out_ref[...] = out_ref[...] + prod.astype(out_ref.dtype)

    # Apply sqrt(d_model) exactly once, on the last vocab step.
    @pl.when(j == nj - 1)
    def _():
        out_ref[...] = out_ref[...] * scale


def embeddings_forward(ids, table, *, tokens_per_tile=256, vocab_tile=512,
                       resident_table_bytes=8 << 20, max_resident_vocab=4096):
    """Equivalent of Embeddings.forward: lut(x) * sqrt(d_model)."""
    B, S = ids.shape
    vocab, d_model = table.shape
    N = B * S
    scale = math.sqrt(float(d_model))

    # ---- Token tiling: multiple of 8 sublanes, >= 2 tiles when possible (v7x has
    # two TensorCores and shards the "parallel" axis across them), and minimal pad.
    T0 = min(tokens_per_tile, _round_up(N, 8))
    n_tok_tiles = _cdiv(N, T0)
    if n_tok_tiles < 2 and N > 8:
        n_tok_tiles = 2
    T = max(8, _round_up(_cdiv(N, n_tok_tiles), 8))
    N_pad = n_tok_tiles * T

    flat_ids = ids.reshape(N).astype(jnp.int32)
    if N_pad != N:
        flat_ids = jnp.pad(flat_ids, (0, N_pad - N))   # padded slots -> row 0, sliced off
    flat_ids = flat_ids.reshape(N_pad, 1)

    # ---- Vocab tiling: resident fast path when the whole table fits comfortably
    # in VMEM (single full-array tile -> DMA'd once, never re-streamed); otherwise
    # stream (tv, d_model) tiles along the reduction axis.
    table_bytes = vocab * d_model * table.dtype.itemsize
    table_fits = table_bytes <= resident_table_bytes and vocab <= max_resident_vocab
    if table_fits:
        tv = vocab                      # full array dims -> no (8,128) constraint, no pad
        n_vocab_tiles = 1
        ragged_last = False
    else:
        tv = min(vocab_tile, _round_up(vocab, 8))
        n_vocab_tiles = _cdiv(vocab, tv)
        ragged_last = (vocab % tv) != 0

    kernel = functools.partial(_embed_kernel, scale=scale, vocab=vocab,
                               ragged_last=ragged_last)
    grid = (N_pad // T, n_vocab_tiles)

    # ---- Scoped VMEM: table (double-buffered) + output tile (double-buffered)
    # + one-hot / ids temporaries, with headroom.  Clamp below v7x's 64 MiB physical.
    est = (2 * tv * d_model + 2 * T * d_model + T * max(tv, 128) + T * 128) * 4 + (2 << 20)
    vmem_limit = int(min(max(est, 32 << 20), 56 << 20))

    out_flat = pl.pallas_call(
        kernel,
        out_shape=jax.ShapeDtypeStruct((N_pad, d_model), table.dtype),
        grid_spec=pltpu.PrefetchScalarGridSpec(
            num_scalar_prefetch=0,
            grid=grid,
            in_specs=[
                # Token ids for this tile; block index constant along the vocab
                # axis, so the DMA is not re-issued per table tile.
                pl.BlockSpec((T, 1), lambda i, j: (i, 0)),
                # Embedding table: constant block (resident) when n_vocab_tiles==1,
                # otherwise streamed sequentially over the vocab axis.
                pl.BlockSpec((tv, d_model), lambda i, j: (j, 0)),
            ],
            out_specs=pl.BlockSpec((T, d_model), lambda i, j: (i, 0)),
        ),
        compiler_params=pltpu.CompilerParams(
            dimension_semantics=("parallel", "arbitrary"),
            vmem_limit_bytes=vmem_limit),
    )(flat_ids, table)

    out = out_flat if N_pad == N else out_flat[:N]
    return out.reshape(B, S, d_model)


if __name__ == "__main__":
    # Small, module-consistent shapes.
    d_model = 128
    vocab = 64
    batch, seq = 2, 8

    key = jax.random.PRNGKey(0)
    k_table, k_ids = jax.random.split(key)

    # nn.Embedding default init: weight ~ N(0, 1), shape (vocab, d_model).
    table = jax.random.normal(k_table, (vocab, d_model), dtype=jnp.float32)
    ids = jax.random.randint(k_ids, (batch, seq), 0, vocab, dtype=jnp.int32)

    out = embeddings_forward(ids, table)
    out = jax.block_until_ready(out)

    # Reference check (plain JAX): lut(x) * sqrt(d_model)
    ref = table[ids] * math.sqrt(float(d_model))
    assert out.shape == (batch, seq, d_model)
    assert jnp.allclose(out, ref, atol=1e-5, rtol=1e-5)

    print("KERNEL_OK")
</pallas_src>

<mosaic_0001>
module attributes {stable_mosaic.version = 11 : i64} {
  func.func @_embed_kernel(%arg0: i32, %arg1: i32, %arg2: memref<8x1xi32, #tpu.memory_space<vmem>>, %arg3: memref<64x128xf32, #tpu.memory_space<vmem>>, %arg4: memref<8x128xf32, #tpu.memory_space<vmem>>) attributes {dimension_semantics = [#tpu.dimension_semantics<parallel>, #tpu.dimension_semantics<arbitrary>], iteration_bounds = array<i64: 2, 1>, scalar_prefetch = 0 : i64, scratch_operands = 0 : i64, tpu.core_type = #tpu.core_type<tc>, window_params = [{transform_indices = @transform_0, window_bounds = array<i64: 8, 1>}, {transform_indices = @transform_1, window_bounds = array<i64: 64, 128>}, {transform_indices = @transform_2, window_bounds = array<i64: 8, 128>}]} {
    %c0 = arith.constant 0 : index
    %c0_0 = arith.constant 0 : index
    %0 = vector.load %arg3[%c0, %c0_0] : memref<64x128xf32, #tpu.memory_space<vmem>>, vector<64x128xf32>
    %c0_1 = arith.constant 0 : index
    %c0_2 = arith.constant 0 : index
    %1 = vector.load %arg2[%c0_1, %c0_2] : memref<8x1xi32, #tpu.memory_space<vmem>>, vector<8x1xi32>
    %c64_i32 = arith.constant 64 : i32
    %2 = arith.muli %arg1, %c64_i32 : i32
    %3 = vector.broadcast %2 : i32 to vector<8x1xi32>
    %4 = arith.subi %1, %3 : vector<8x1xi32>
    %5 = tpu.iota {dimensions = array<i32: 1>} : vector<8x64xi32>
    %6 = vector.broadcast %4 : vector<8x1xi32> to vector<8x64xi32>
    %7 = arith.cmpi eq, %6, %5 : vector<8x64xi32>
    %8 = arith.extui %7 : vector<8x64xi1> to vector<8x64xi32>
    %9 = arith.sitofp %8 : vector<8x64xi32> to vector<8x64xf32>
    %cst = arith.constant dense<0.000000e+00> : vector<8x128xf32>
    %10 = tpu.matmul %9, %0, %cst {dimension_numbers = #tpu.dot_dimension_numbers<[1], [0], [0], [1], [0, 0, 1, 1], [], []>} : vector<8x64xf32>, vector<64x128xf32>, vector<8x128xf32> -> vector<8x128xf32>
    %c0_i32 = arith.constant 0 : i32
    %11 = arith.cmpi eq, %arg1, %c0_i32 : i32
    %12 = arith.extui %11 : i1 to i32
    %c0_i32_3 = arith.constant 0 : i32
    %13 = arith.cmpi ne, %12, %c0_i32_3 : i32
    scf.if %13 {
      %c0_8 = arith.constant 0 : index
      %c0_9 = arith.constant 0 : index
      %20 = vector.load %arg4[%c0_8, %c0_9] : memref<8x128xf32, #tpu.memory_space<vmem>>, vector<8x128xf32>
      tpu.vector_store %arg4[%c0_8, %c0_9], %10 {strides = array<i32>} : memref<8x128xf32, #tpu.memory_space<vmem>>, vector<8x128xf32>,
    } else {
    }
    %c0_i32_4 = arith.constant 0 : i32
    %14 = arith.cmpi sgt, %arg1, %c0_i32_4 : i32
    %15 = arith.extui %14 : i1 to i32
    %c0_i32_5 = arith.constant 0 : i32
    %16 = arith.cmpi ne, %15, %c0_i32_5 : i32
    scf.if %16 {
      %c0_8 = arith.constant 0 : index
      %c0_9 = arith.constant 0 : index
      %20 = vector.load %arg4[%c0_8, %c0_9] : memref<8x128xf32, #tpu.memory_space<vmem>>, vector<8x128xf32>
      %21 = arith.addf %20, %10 : vector<8x128xf32>
      %c0_10 = arith.constant 0 : index
      %c0_11 = arith.constant 0 : index
      %22 = vector.load %arg4[%c0_10, %c0_11] : memref<8x128xf32, #tpu.memory_space<vmem>>, vector<8x128xf32>
      tpu.vector_store %arg4[%c0_10, %c0_11], %21 {strides = array<i32>} : memref<8x128xf32, #tpu.memory_space<vmem>>, vector<8x128xf32>,
    } else {
    }
    %c0_i32_6 = arith.constant 0 : i32
    %17 = arith.cmpi eq, %arg1, %c0_i32_6 : i32
    %18 = arith.extui %17 : i1 to i32
    %c0_i32_7 = arith.constant 0 : i32
    %19 = arith.cmpi ne, %18, %c0_i32_7 : i32
    scf.if %19 {
      %c0_8 = arith.constant 0 : index
      %c0_9 = arith.constant 0 : index
      %20 = vector.load %arg4[%c0_8, %c0_9] : memref<8x128xf32, #tpu.memory_space<vmem>>, vector<8x128xf32>
      %cst_10 = arith.constant 11.3137083 : f32
      %21 = vector.broadcast %cst_10 : f32 to vector<8x128xf32>
      %22 = arith.mulf %20, %21 : vector<8x128xf32>
      %c0_11 = arith.constant 0 : index
      %c0_12 = arith.constant 0 : index
      %23 = vector.load %arg4[%c0_11, %c0_12] : memref<8x128xf32, #tpu.memory_space<vmem>>, vector<8x128xf32>
      tpu.vector_store %arg4[%c0_11, %c0_12], %22 {strides = array<i32>} : memref<8x128xf32, #tpu.memory_space<vmem>>, vector<8x128xf32>,
    } else {
    }
    return
  }
  func.func @transform_0(%arg0: i32, %arg1: i32) -> (i32, i32) {
    %c0_i32 = arith.constant 0 : i32
    %c0_i32_0 = arith.constant 0 : i32
    return %arg0, %c0_i32 : i32, i32
  }
  func.func @transform_1(%arg0: i32, %arg1: i32) -> (i32, i32) {
    %c0_i32 = arith.constant 0 : i32
    %c0_i32_0 = arith.constant 0 : i32
    return %arg1, %c0_i32 : i32, i32
  }
  func.func @transform_2(%arg0: i32, %arg1: i32) -> (i32, i32) {
    %c0_i32 = arith.constant 0 : i32
    %c0_i32_0 = arith.constant 0 : i32
    return %arg0, %c0_i32 : i32, i32
  }
}

</mosaic_0001>

<bundles_post_ra>
// kernel: tpu_custom_call.1
= control target key start
LH: loop header
LB: loop body
LE: loop exit
PB: predicated region body
PF: predicated region fallthrough
CT: control target
= control target key end

     0   :  { %7 = vsyncpa [#allocation3], 0  ;;  %s795_s0 = inlined_call_operand.vmem [shape: s32[16,1], index: 0, kind: input, shape index: {}]   ;;  %s796_s1 = inlined_call_operand.hbm [shape: f32[64,128], index: 1, kind: input, shape index: {}]   ;;  %s797_s2 = inlined_call_operand.hbm [shape: f32[16,128], index: 2, kind: output, shape index: {}]  }
   0x1   :  { %8 = vsyncpa [#allocation4], 0 }
   0x2   :  { %10 = vsyncpa [#allocation4 + $0x1], 0  ;;  %s645_s9 = smov 0   ;;  %s647_s10 = smov 0  }
   0x3   :  { %s649_s11 = smov 0   ;;  %s651_s12 = smov 0  }
   0x4   :  { %s653_s13 = smov 0   ;;  %s655_s14 = smov 0  }
   0x5 LB: > { %s382_s15 = sadd.s32 4294967295, %s620_s14   ;;  %s383_s16 = sadd.s32 4294967294, %s620_s14   ;;  %s620_s14 = sphi %s655_s14, %s16_s14   ;;  %s616_s13 = sphi %s653_s13, %s815_s13   ;;  %s612_s12 = sphi %s651_s12, %s814_s12   ;;  %s608_s11 = sphi %s649_s11, %s813_s11   ;;  %s604_s10 = sphi %s647_s10, %s812_s10   ;;  %s600_s9 = sphi %s645_s9, %s811_s9  }
   0x6   : > { %s28_s17 = sadd.s32 1, %s616_s13  ;;  %s87_s18 = sadd.s32 1, %s608_s11 }
   0x7   : > { %p30_p0 = scmp.ge.s32.totalorder %s28_s17, 2  ;;  %p97_p1 = scmp.ne.s32.totalorder %s608_s11, %s604_s10 }
   0x8   : > { %p98_p2 = scmp.eq.s32.totalorder %s382_s15, 1  ;;  %p103_p3 = scmp.ne.s32.totalorder %s604_s10, %s600_s9 }
   0x9   : > { %s817_s17 = smov (%p30_p0, %s28_s17), 0  ;;  %p104_p5 = scmp.eq.s32.totalorder %s383_s16, 1 }
   0xa   : > { %p685_p4 = por %p98_p2, %p97_p1  ;;  %s84_s20 = ssub.s32 %s616_s13, %s817_s17 }
   0xb   : > { %p384_p6 = scmp.ge.s32.totalorder %s620_s14, 1  ;;  %p85_p7 = scmp.eq.s32.totalorder %s84_s20, 0 }
   0xc   : > { %s802_s19 = scalar_select %p685_p4, 1, 0 }
   0xd   : > { %p692_p8 = por %p104_p5, %p103_p3  ;;  %p111_p9 = scmp.lt.s32.totalorder %s620_s14, 3 }
   0xe   : > { %s698_s22 = scalar_select %p85_p7, %s608_s11, %s87_s18  }
   0xf   : > { %s803_s21 = scalar_select %p692_p8, 1, 0 }
  0x10   : > { %p700_p10 = pnand %p384_p6, %p111_p9  ;;  %p704_p11 = scmp.eq.s32.totalorder %s382_s15, 0 }
  0x11   : > { %s622_s25 = smov [#allocation2]   ;;  %s510_s30 = scalar_lea.hbm %s796_s1, 1024 }
  0x12   : > { %s804_s23 = scalar_select %p700_p10, 1, 0 }
  0x13   : > { %s805_s24 = scalar_select %p704_p11, 1, 0 }
  0x14   : > { %p443_p12 = pneg %p700_p10  ;;  %s126_s26 = sshll.u32 %s622_s25, 4  ;;  %s127_s26 = int_to_ptr.vmem [resolvable:$true] %s126_s26 }
  0x15   : > { %p511_p0 = scmp.ne.s32.totalorder %s796_s1, %s510_s30  ;;  %p517_p5 = scmp.lt.u32.totalorder %s510_s30, %s796_s1 }
  0x16   : > { %p712_p13 = pnand %p704_p11, %p443_p12 }
  0x18   : > { %p512_p1 = pneg %p712_p13 }
  0x1a   : > { %p513_p2 = pnand %p512_p1, %p511_p0 }
  0x1c   : > { %p514_p3 = pneg %p513_p2 }
  0x1e   : > { %p519_p6 = pnand %p517_p5, %p514_p3 }
  0x20   : > { %522 = shalt.err (!%p519_p6)
}
  0x21   : > { %s523_s7 = scalar_lea.vmem %s127_s26, 1024  ;;  %p531_p8 = scmp.lt.s32.totalorder %s127_s26, %s127_s26 }
  0x22   : > { %p524_p7 = scmp.ne.s32.totalorder %s127_s26, %s523_s7  ;;  %p532_p4 = scmp.lt.s32.totalorder %s523_s7, %s523_s7 }
  0x24   : > { %p526_p9 = pnand %p524_p7, %p512_p1  ;;  %p533_p11 = por %p532_p4, %p531_p8 }
  0x26   : > { %p527_p12 = pneg %p526_p9 }
  0x28   : > { %p534_p10 = pnand %p533_p11, %p527_p12 }
  0x2a   : > { %537 = shalt.err (!%p534_p10)
}
  0x2b   : > { %s623_s8 = smov 128   ;;  %s624_s15 = smov 8  }
  0x2c   : > { %446 = dma.hbm_to_vmem [thread:$0]  (!%p712_p13), %s796_s1, 1024, %s127_s26, [#allocation3], %s623_s8, %s623_s8, %s624_s15  }
  0x2d   : > { %p807_p0 = scmp.ne.s32.totalorder %s804_s23, 0 }
  0x2e   : > { %p808_p2 = scmp.ne.s32.totalorder (!%p807_p0), %s805_s24, 0 }
  0x2f   : > { %149 = sbr.rel (%p807_p0) target bundleno = 420 (0x1a4), region = 28 }
  0x36   : > { %591 = dma.done.wait (%p808_p2), [#allocation3], 1024  }
  0x37   : > { %593 = vsyncadd (%p808_p2), [#allocation3], 4294966272  ;;  %p170_p4 = scmp.lt.s32.totalorder %s612_s12, 1  ;;  %v625_v0 = vmov 0   ;;  %v626_v1 = vmov 0.0|0.0   ;;  %v175_v3 = vld [vmem:[#allocation2] sm:$0xff]  ;;  %v187_v16 = vlaneseq }
  0x38   : > { %509 = vset.pattern.permute.xlu0 %v625_v0  ;;  %425 = vmatprep.subr.bf16.mxu0 %v626_v1  ;;  %v176_v4 = vld [vmem:[#allocation2 + $0x8] sm:$0xff]  ;;  %v177_v6 = vld [vmem:[#allocation2 + $0x10] sm:$0xff]  ;;  %v178_v7 = vld [vmem:[#allocation2 + $0x18] sm:$0xff]  ;;  %vm627_vm0 = vmmov 0   ;;  %v628_v8 = vmov 0.0   ;;  %vm195_vm1 = vcmask 523264  }
  0x39   : > { %s171_s20 = scalar_select %p170_p4, %s612_s12, 1  ;;  %v426_v5 = vpack.c.bf16 %v176_v4, %v175_v3  ;;  %422 = vmatprep.mubr.msk.f32.mxu0 %vm627_vm0, %v628_v8  ;;  %v429_v9 = vpack.c.bf16 %v178_v7, %v177_v6  ;;  %v179_v10 = vld [vmem:[#allocation2 + $0x20] sm:$0xff]  ;;  %v180_v11 = vld [vmem:[#allocation2 + $0x28] sm:$0xff]  ;;  %v181_v13 = vld [vmem:[#allocation2 + $0x30] sm:$0xff]  ;;  %v188_v17 = vand.u32 127, %v187_v16 }
  0x3a   : > { %v432_v12 = vpack.c.bf16 %v180_v11, %v179_v10  ;;  %v182_v14 = vld [vmem:[#allocation2 + $0x38] sm:$0xff]  ;;  %s167_s24 = sand.u32 1, %s604_s10   ;;  %s394_s29 = sshll.u32 %s612_s12, 7 }
  0x3b   : > { %s390_s25 = sshll.u32 %s171_s20, 3  ;;  %427 = vmatpush3.bf16.msra.mxu0 %v426_v5  ;;  %v435_v15 = vpack.c.bf16 %v182_v14, %v181_v13  ;;  %s389_s28 = sshll.u32 %s167_s24, 3 }
  0x3c   : > { %s173_s23 = scalar_lea.vmem %s795_s0, %s390_s25  ;;  %428 = vmatprep.subr.bf16.mxu0 %v626_v1  ;;  %s169_s30 = scalar_lea.vmem [#allocation5], %s389_s28 }
  0x3d   : > { %v183_v2 = vld [vmem:[%s173_s23] sm:$0xff]  ;;  %s301_s3 = sshll.u32 %s169_s30, 4  ;;  %s748_s6 = scalar_lea.hbm %s797_s2, %s394_s29  ;;  %s750_s3 = int_to_ptr.vmem [resolvable:$true] %s301_s3 }
  0x3e   : > { %190 = vperm.xlu0 %509, %v183_v2   ;;  %s288_s7 = scalar_lea.sflag [#allocation4], %s167_s24  ;;  %s538_s8 = scalar_lea.vmem %s750_s3, 128 }
  0x3f   : > { %430 = vmatpush3.bf16.msra.mxu0 %v429_v9  ;;  %p539_p8 = scmp.ne.s32.totalorder %s750_s3, %s538_s8  ;;  %p809_p10 = scmp.ne.s32.totalorder %s802_s19, 0 }
  0x40   : > { %431 = vmatprep.subr.bf16.mxu0 %v626_v1  ;;  %s629_s12 = smov [#allocation5]  }
  0x41   : > { %p540_p11 = pnand %p539_p8, %p809_p10  ;;  %s542_s15 = sshll.u32 %s629_s12, 4  ;;  %s543_s15 = int_to_ptr.vmem [resolvable:$false] %s542_s15 }
  0x42   : > { %s544_s16 = scalar_lea.vmem %s543_s15, 256  ;;  %p545_p1 = scmp.lt.s32.totalorder %s750_s3, %s543_s15 }
  0x43   : > { %433 = vmatpush3.bf16.msra.mxu0 %v432_v12  ;;  %p541_p13 = pneg %p540_p11  ;;  %p546_p3 = scmp.lt.s32.totalorder %s544_s16, %s538_s8 }
  0x44   : > { %434 = vmatprep.subr.bf16.mxu0 %v626_v1 }
  0x45   : > { %p547_p5 = por %p546_p3, %p545_p1 }
  0x47   : > { %436 = vmatpush3.bf16.msra.mxu0 %v435_v15  ;;  %p548_p6 = pnand %p547_p5, %p541_p13 }
  0xbd   : > { %v191_v18 = vpop.permute.xlu0 %190 }
  0xbe   : > { %vm192_vm2 = vcmp.eq.s32.totalorder %v191_v18, %v188_v17 }
  0xbf   : > { %v391_v19 = vsel %vm192_vm2, 1.0, %v628_v8 }
  0xc0   : > { %423 = vmatmul.mubr.msk.f32.vlgmr.msra.gmra.mrb[0].mxu0 %vm195_vm1, %v391_v19 }
 0x193   : > { %v265_v20 = vpop.f32.mrb[0].mxu0 }
 0x194   : > { %v285_v21 = vmul.f32 11.313708, %v265_v20  ;;  %v424_v22 = vpop.f32.mrb[1].mxu0 }
 0x196   : > { %286 = vst [vmem:[%s169_s30] sm:$0xff] %v285_v21 }
 0x197   : > { %551 = shalt.err (!%p548_p6)
}
 0x198   : > { %s552_s18 = scalar_lea.hbm %s748_s6, 128  ;;  %s556_s27 = scalar_lea.hbm %s797_s2, 256 }
 0x199   : > { %p553_p7 = scmp.ne.s32.totalorder %s748_s6, %s552_s18  ;;  %p557_p0 = scmp.lt.u32.totalorder %s748_s6, %s797_s2 }
 0x19a   : > { %p558_p2 = scmp.lt.u32.totalorder %s556_s27, %s552_s18  ;;  %p560_p8 = scmp.lt.u32.totalorder %s552_s18, %s748_s6 }
 0x19b   : > { %p554_p9 = pnand %p553_p7, %p809_p10 }
 0x19c   : > { %p559_p4 = por %p558_p2, %p557_p0 }
 0x19d   : > { %p555_p12 = pneg %p554_p9 }
 0x19e   : > { %p561_p11 = por %p560_p8, %p559_p4 }
 0x1a0   : > { %p562_p13 = pnand %p561_p11, %p555_p12 }
 0x1a2   : > { %565 = shalt.err (!%p562_p13)
}
 0x1a3   : > { %441 = dma.vmem_to_hbm [thread:$0]  (%p809_p10), %s750_s3, 128, %s748_s6, %s288_s7  }
 0x1a4 PF: > { %p453_p1 = scmp.ge.s32.totalorder %s620_s14, 2  ;;  %s313_s24 = sand.u32 1, %s600_s9  }
 0x1a5   : > { %p810_p3 = scmp.ne.s32.totalorder %s803_s21, 0  ;;  %s314_s28 = scalar_lea.sflag [#allocation4], %s313_s24 }
 0x1a7   : > { %p448_p5 = pnand %p453_p1, %p810_p3 }
 0x1a9   : > { %595 = dma.done.wait (!%p448_p5), %s314_s28, 128  }
 0x1aa   : > { %597 = vsyncadd (!%p448_p5), %s314_s28, 4294967168  ;;  %s16_s14 = sadd.s32 1, %s620_s14   ;;  %s811_s9 = smov %s604_s10 }
 0x1ab   : > { %p13_p6 = scmp.ge.s32.totalorder %s16_s14, 4   ;;  %s812_s10 = smov %s608_s11 }
 0x1ac   : > { %s813_s11 = smov %s698_s22  ;;  %s814_s12 = smov %s616_s13 }
 0x1ad   : > { %s815_s13 = smov %s817_s17  ;;  %15 = sbr.rel (!%p13_p6) target bundleno = 5 (0x5), region = 81 }
 0x1b4   :  { %319 = vsyncpa [#allocation3], 1 }
 0x1b5   :  { %321 = vsyncpa [#allocation3 + $0x1], 1 }
 0x1b6   :  { %322 = vsyncpa [#allocation4], 1 }
 0x1b7   :  { %324 = vsyncpa [#allocation4 + $0x1], 1 }

</bundles_post_ra>
